<compile_context>
chip_gen: v6e
topology: v6e:2x2x1
jax: 0.10.0
libtpu: 0.0.40
codegen_flags: <defaults>
</compile_context>

<pallas_src>
import math

import jax
import jax.numpy as jnp
import numpy as np
from jax.experimental import pallas as pl
from jax.experimental.pallas import tpu as pltpu


# --- util.* from the reference module is not provided; use the standard
#     "same size" convention.  TODO(synk): replace if util semantics differ.
def kernel_size_to_stride(kernel_size: int, input_size: int) -> int:
    return 1


def same_size_padding(kernel_size: int, stride: int) -> int:
    return (kernel_size - 1) // 2


def _usable_vmem_bytes() -> int:
    """Generation-aware usable VMEM (v7x: 64 MiB physical, v5e/v6e: 128 MiB)."""
    try:
        cap = int(pltpu.get_tpu_info().vmem_capacity_bytes)
    except Exception:
        cap = 64 << 20            # conservative fallback (safe on every gen)
    return int(min(cap * 3 // 4, 100 << 20))


def _largest_divisor_leq(n: int, cap: int) -> int:
    cap = max(1, min(n, cap))
    for d in range(cap, 0, -1):
        if n % d == 0:
            return d
    return 1


def make_conv_pool_stats_kernel(NB, L_pool, K, conv_stride, P, matmul_dtype):
    """Pass 1: fused Conv1d + MaxPool1d + per-channel sum / sum-of-squares."""

    def kernel(x_ref, w_ref, y_ref, stats_ref):
        # x_ref:     (NB, L_padded, C_in)   current batch block
        # w_ref:     (K, C_in, C_out)       conv weights, taps major
        # y_ref:     (NB, L_pool, C_out)    streamed pre-norm output (f32)
        # stats_ref: (2, C_out)             resident accumulator (sum, sumsq)
        i = pl.program_id(0)

        @pl.when(i == 0)
        def _():
            stats_ref[...] = jnp.zeros_like(stats_ref)

        w_all = w_ref[...]
        if matmul_dtype is not None:          # bf16 operands -> native MXU width
            w_all = w_all.astype(matmul_dtype)

        C_in = x_ref.shape[-1]
        NBL = NB * L_pool
        step = conv_stride * P

        pooled = None
        for r in range(P):                    # pool phases (VPU max)
            acc = None
            for k in range(K):                # conv taps (MXU accumulation, f32)
                start = r * conv_stride + k
                idx = (pl.ds(start, L_pool) if step == 1
                       else pl.ds(start, L_pool, step))
                xk = x_ref[:, idx, :]                       # (NB, L_pool, C_in)
                xk = xk.reshape(NBL, C_in)                  # fold batch into M
                if matmul_dtype is not None:
                    xk = xk.astype(matmul_dtype)
                d = jnp.dot(xk, w_all[k], preferred_element_type=jnp.float32)
                acc = d if acc is None else acc + d
            pooled = acc if pooled is None else jnp.maximum(pooled, acc)

        # Stream this block's pre-norm activations.  Kept in f32 so BatchNorm
        # statistics / normalization match the f32 reference exactly.
        y_ref[...] = pooled.reshape(y_ref.shape)

        # Incremental per-channel moments (hidden under per-block DMA/matmul,
        # so the final epilogue is just a tiny per-channel affine).
        stats_ref[0:1, :] += jnp.sum(pooled, axis=0, keepdims=True)
        stats_ref[1:2, :] += jnp.sum(pooled * pooled, axis=0, keepdims=True)

    return kernel


def bn_relu_kernel(y_ref, ss_ref, o_ref):
    """Pass 2: y * scale + shift, then ReLU.  Independent per block."""
    ss = ss_ref[...]                          # (2, C_out) f32
    scale = ss[0:1, :][None]                  # (1, 1, C_out)
    shift = ss[1:2, :][None]
    y = y_ref[...]                            # (NB2, L_pool, C_out) f32
    o_ref[...] = jnp.maximum(y * scale + shift, 0.0).astype(o_ref.dtype)


def conv_block_forward(x, w, b, gamma, beta, *, kernel_size, stride, padding,
                       pool_stride, eps=1e-5, matmul_dtype=jnp.bfloat16):
    """x: (N, C_in, L) like PyTorch; returns (N, C_out, L_out).

    matmul_dtype: MXU operand dtype (default bf16, f32 accumulation).  Pass
    None for bit-exact f32 operands.

    NOTE: the conv bias `b` is accepted for API parity but never used: a
    per-channel constant added before train-mode BatchNorm cancels exactly in
    the mean subtraction (max-pool commutes with a per-channel constant).
    """
    N, C_in, L = x.shape
    C_out = w.shape[0]
    K = kernel_size
    L_padded = L + 2 * padding
    L_conv = (L_padded - K) // stride + 1
    pool_active = 1 < pool_stride <= L
    P = pool_stride if pool_active else 1
    L_pool = L_conv // P

    usable_vmem = _usable_vmem_bytes()

    # ---- batch blocking: grow the MXU M dim (NB*L_pool rows per matmul) -----
    per_batch1 = 4 * (2 * L_padded * C_in + 2 * L_pool * C_out
                      + 2 * L_conv * (C_in + C_out) + 256)
    nb_cap = max(1, (usable_vmem // 2) // per_batch1)
    nb_target = max(1, -(-512 // max(L_conv, 1)))        # ~512 matmul rows
    NB = _largest_divisor_leq(N, min(nb_cap, nb_target))
    grid1 = N // NB

    per_batch2 = 4 * (4 * L_pool * C_out) + 256
    nb2_cap = max(1, (usable_vmem // 2) // per_batch2)
    nb2_target = max(1, -(-2048 // max(L_pool, 1)))      # big streamed tiles
    NB2 = _largest_divisor_leq(N, min(nb2_cap, nb2_target))
    grid2 = N // NB2

    # ---- layout glue: channels last (lanes), taps-major weights -------------
    # TODO(synk): for production sizes fold the pad/transpose into a pre-packed
    # input layout to avoid this extra HBM round trip.
    xp = jnp.pad(x, ((0, 0), (0, 0), (padding, padding)))
    x_nlc = jnp.transpose(xp, (0, 2, 1)).astype(jnp.float32)   # (N, L_padded, C_in)
    w_kio = jnp.transpose(w, (2, 1, 0)).astype(jnp.float32)    # (K, C_in, C_out)

    kernel1 = make_conv_pool_stats_kernel(NB, L_pool, K, stride, P, matmul_dtype)

    y_pre, stats = pl.pallas_call(
        kernel1,
        out_shape=(
            jax.ShapeDtypeStruct((N, L_pool, C_out), jnp.float32),
            jax.ShapeDtypeStruct((2, C_out), jnp.float32),
        ),
        grid_spec=pltpu.PrefetchScalarGridSpec(
            num_scalar_prefetch=0,
            grid=(grid1,),
            in_specs=[
                pl.BlockSpec((NB, L_padded, C_in), lambda i: (i, 0, 0)),
                pl.BlockSpec((K, C_in, C_out), lambda i: (0, 0, 0)),
            ],
            out_specs=[
                pl.BlockSpec((NB, L_pool, C_out), lambda i: (i, 0, 0)),
                pl.BlockSpec((2, C_out), lambda i: (0, 0)),
            ],
        ),
        compiler_params=pltpu.CompilerParams(
            # stats accumulator is resident across the batch-block axis
            dimension_semantics=("arbitrary",),
            vmem_limit_bytes=usable_vmem,
        ),
    )(x_nlc, w_kio)

    # ---- BatchNorm(train) affine from the accumulated global moments --------
    count = float(N * L_pool)
    mean = stats[0] / count
    var = jnp.maximum(stats[1] / count - mean * mean, 0.0)
    inv = jax.lax.rsqrt(var + eps)
    scale = gamma.astype(jnp.float32) * inv
    shift = beta.astype(jnp.float32) - mean * scale
    ss = jnp.stack([scale, shift], axis=0)                     # (2, C_out)

    # ---- pass 2: normalize + ReLU, streamed and parallel over blocks --------
    out_nlc = pl.pallas_call(
        bn_relu_kernel,
        out_shape=jax.ShapeDtypeStruct((N, L_pool, C_out), x.dtype),
        grid_spec=pltpu.PrefetchScalarGridSpec(
            num_scalar_prefetch=0,
            grid=(grid2,),
            in_specs=[
                pl.BlockSpec((NB2, L_pool, C_out), lambda j: (j, 0, 0)),
                pl.BlockSpec((2, C_out), lambda j: (0, 0)),
            ],
            out_specs=pl.BlockSpec((NB2, L_pool, C_out), lambda j: (j, 0, 0)),
        ),
        compiler_params=pltpu.CompilerParams(
            # pure elementwise over independent blocks -> v7x's 2nd TC can help
            dimension_semantics=("parallel",),
            vmem_limit_bytes=usable_vmem,
        ),
    )(y_pre, ss)

    # back to PyTorch (N, C_out, L_out)
    return jnp.transpose(out_nlc, (0, 2, 1))


def reference_forward(x, w, b, gamma, beta, kernel_size, stride, padding,
                      pool_stride, eps=1e-5):
    """Pure-JAX reference of the PyTorch forward (training-mode BatchNorm)."""
    N, C_in, L = x.shape
    C_out, _, K = w.shape
    xp = jnp.pad(x, ((0, 0), (0, 0), (padding, padding)))
    L_conv = (L + 2 * padding - K) // stride + 1
    cols = jnp.stack(
        [xp[:, :, k:k + stride * L_conv:stride] for k in range(K)], axis=-1)
    y = jnp.einsum('nclk,ock->nol', cols, w) + b[None, :, None]
    if 1 < pool_stride <= L:
        L_pool = L_conv // pool_stride
        y = y[:, :, :L_pool * pool_stride].reshape(
            N, C_out, L_pool, pool_stride).max(-1)
    mean = y.mean(axis=(0, 2), keepdims=True)
    var = ((y - mean) ** 2).mean(axis=(0, 2), keepdims=True)
    yhat = (y - mean) / jnp.sqrt(var + eps)
    out = yhat * gamma[None, :, None] + beta[None, :, None]
    return jnp.maximum(out, 0.0)


if __name__ == "__main__":
    # ConvBlock(in_chan=4, input_size=16, out_chan_log2=3, kernel_size=3, pool_stride=2)
    in_chan, input_size, out_chan_log2, kernel_size, pool_stride = 4, 16, 3, 3, 2
    out_chan = 2 ** out_chan_log2
    ksize = 1 if input_size == 1 else kernel_size
    stride = kernel_size_to_stride(ksize, input_size)
    padding = same_size_padding(ksize, stride)
    N = 2

    key = jax.random.PRNGKey(0)
    kx, kw, kb = jax.random.split(key, 3)
    x = jax.random.normal(kx, (N, in_chan, input_size), jnp.float32)
    bound = 1.0 / math.sqrt(in_chan * ksize)            # Conv1d default-style init
    w = jax.random.uniform(kw, (out_chan, in_chan, ksize), jnp.float32, -bound, bound)
    b = jax.random.uniform(kb, (out_chan,), jnp.float32, -bound, bound)
    gamma = jnp.ones((out_chan,), jnp.float32)           # BatchNorm1d default init
    beta = jnp.zeros((out_chan,), jnp.float32)

    ref = reference_forward(x, w, b, gamma, beta, ksize, stride, padding,
                            pool_stride)

    # Exact path (f32 MXU operands) -> tight tolerance against the reference.
    out_f32 = conv_block_forward(x, w, b, gamma, beta, kernel_size=ksize,
                                 stride=stride, padding=padding,
                                 pool_stride=pool_stride, matmul_dtype=None)
    out_f32 = jax.block_until_ready(out_f32)
    assert out_f32.shape == ref.shape, (out_f32.shape, ref.shape)
    np.testing.assert_allclose(np.asarray(out_f32), np.asarray(ref),
                               atol=1e-4, rtol=1e-4)

    # Default fast path (bf16 MXU operands, f32 accumulation) -> loose tolerance.
    out_bf16 = conv_block_forward(x, w, b, gamma, beta, kernel_size=ksize,
                                  stride=stride, padding=padding,
                                  pool_stride=pool_stride)
    out_bf16 = jax.block_until_ready(out_bf16)
    np.testing.assert_allclose(np.asarray(out_bf16), np.asarray(ref),
                               atol=5e-2, rtol=5e-2)

    print("KERNEL_OK")
</pallas_src>

<mosaic_0001>
module attributes {stable_mosaic.version = 11 : i64} {
  func.func @kernel(%arg0: i32, %arg1: memref<2x18x4xf32, #tpu.memory_space<vmem>>, %arg2: memref<3x4x8xf32, #tpu.memory_space<vmem>>, %arg3: memref<2x8x8xf32, #tpu.memory_space<vmem>>, %arg4: memref<2x8xf32, #tpu.memory_space<vmem>>) attributes {dimension_semantics = [#tpu.dimension_semantics<arbitrary>], iteration_bounds = array<i64: 1>, scalar_prefetch = 0 : i64, scratch_operands = 0 : i64, tpu.core_type = #tpu.core_type<tc>, window_params = [{transform_indices = @transform_0, window_bounds = array<i64: 2, 18, 4>}, {pipeline_mode = #tpu.pipeline_mode<synchronous>, transform_indices = @transform_1, window_bounds = array<i64: 3, 4, 8>}, {transform_indices = @transform_2, window_bounds = array<i64: 2, 8, 8>}, {pipeline_mode = #tpu.pipeline_mode<synchronous>, transform_indices = @transform_3, window_bounds = array<i64: 2, 8>}]} {
    %c0_i32 = arith.constant 0 : i32
    %0 = arith.cmpi eq, %arg0, %c0_i32 : i32
    %1 = arith.extui %0 : i1 to i32
    %c0_i32_0 = arith.constant 0 : i32
    %2 = arith.cmpi ne, %1, %c0_i32_0 : i32
    scf.if %2 {
      %cst_36 = arith.constant 0.000000e+00 : f32
      %52 = vector.broadcast %cst_36 : f32 to vector<2x8xf32>
      %c0_37 = arith.constant 0 : index
      %c0_38 = arith.constant 0 : index
      %53 = vector.load %arg4[%c0_37, %c0_38] : memref<2x8xf32, #tpu.memory_space<vmem>>, vector<2x8xf32>
      tpu.vector_store %arg4[%c0_37, %c0_38], %52 {strides = array<i32>} : memref<2x8xf32, #tpu.memory_space<vmem>>, vector<2x8xf32>,
    } else {
    }
    %c0 = arith.constant 0 : index
    %c0_1 = arith.constant 0 : index
    %c0_2 = arith.constant 0 : index
    %3 = vector.load %arg2[%c0, %c0_1, %c0_2] : memref<3x4x8xf32, #tpu.memory_space<vmem>>, vector<3x4x8xf32>
    %c0_3 = arith.constant 0 : index
    %c0_4 = arith.constant 0 : index
    %c0_5 = arith.constant 0 : index
    %4 = tpu.strided_load %arg1[%c0_3, %c0_4, %c0_5] {strides = array<i32: 1, 2, 1>} : memref<2x18x4xf32, #tpu.memory_space<vmem>>, vector<2x8x4xf32>
    %5 = vector.shape_cast %4 : vector<2x8x4xf32> to vector<16x4xf32>
    %6 = vector.extract_strided_slice %3 {offsets = [0, 0, 0], sizes = [1, 4, 8], strides = [1, 1, 1]} : vector<3x4x8xf32> to vector<1x4x8xf32>
    %7 = vector.shape_cast %6 : vector<1x4x8xf32> to vector<4x8xf32>
    %cst = arith.constant dense<0.000000e+00> : vector<16x8xf32>
    %8 = tpu.matmul %5, %7, %cst {dimension_numbers = #tpu.dot_dimension_numbers<[1], [0], [0], [1], [0, 0, 1, 1], [], []>} : vector<16x4xf32>, vector<4x8xf32>, vector<16x8xf32> -> vector<16x8xf32>
    %c0_6 = arith.constant 0 : index
    %c1 = arith.constant 1 : index
    %c0_7 = arith.constant 0 : index
    %9 = tpu.strided_load %arg1[%c0_6, %c1, %c0_7] {strides = array<i32: 1, 2, 1>} : memref<2x18x4xf32, #tpu.memory_space<vmem>>, vector<2x8x4xf32>
    %10 = vector.shape_cast %9 : vector<2x8x4xf32> to vector<16x4xf32>
    %11 = vector.extract_strided_slice %3 {offsets = [1, 0, 0], sizes = [1, 4, 8], strides = [1, 1, 1]} : vector<3x4x8xf32> to vector<1x4x8xf32>
    %12 = vector.shape_cast %11 : vector<1x4x8xf32> to vector<4x8xf32>
    %cst_8 = arith.constant dense<0.000000e+00> : vector<16x8xf32>
    %13 = tpu.matmul %10, %12, %cst_8 {dimension_numbers = #tpu.dot_dimension_numbers<[1], [0], [0], [1], [0, 0, 1, 1], [], []>} : vector<16x4xf32>, vector<4x8xf32>, vector<16x8xf32> -> vector<16x8xf32>
    %14 = arith.addf %8, %13 : vector<16x8xf32>
    %c0_9 = arith.constant 0 : index
    %c2 = arith.constant 2 : index
    %c0_10 = arith.constant 0 : index
    %15 = tpu.strided_load %arg1[%c0_9, %c2, %c0_10] {strides = array<i32: 1, 2, 1>} : memref<2x18x4xf32, #tpu.memory_space<vmem>>, vector<2x8x4xf32>
    %16 = vector.shape_cast %15 : vector<2x8x4xf32> to vector<16x4xf32>
    %17 = vector.extract_strided_slice %3 {offsets = [2, 0, 0], sizes = [1, 4, 8], strides = [1, 1, 1]} : vector<3x4x8xf32> to vector<1x4x8xf32>
    %18 = vector.shape_cast %17 : vector<1x4x8xf32> to vector<4x8xf32>
    %cst_11 = arith.constant dense<0.000000e+00> : vector<16x8xf32>
    %19 = tpu.matmul %16, %18, %cst_11 {dimension_numbers = #tpu.dot_dimension_numbers<[1], [0], [0], [1], [0, 0, 1, 1], [], []>} : vector<16x4xf32>, vector<4x8xf32>, vector<16x8xf32> -> vector<16x8xf32>
    %20 = arith.addf %14, %19 : vector<16x8xf32>
    %c0_12 = arith.constant 0 : index
    %c1_13 = arith.constant 1 : index
    %c0_14 = arith.constant 0 : index
    %21 = tpu.strided_load %arg1[%c0_12, %c1_13, %c0_14] {strides = array<i32: 1, 2, 1>} : memref<2x18x4xf32, #tpu.memory_space<vmem>>, vector<2x8x4xf32>
    %22 = vector.shape_cast %21 : vector<2x8x4xf32> to vector<16x4xf32>
    %23 = vector.extract_strided_slice %3 {offsets = [0, 0, 0], sizes = [1, 4, 8], strides = [1, 1, 1]} : vector<3x4x8xf32> to vector<1x4x8xf32>
    %24 = vector.shape_cast %23 : vector<1x4x8xf32> to vector<4x8xf32>
    %cst_15 = arith.constant dense<0.000000e+00> : vector<16x8xf32>
    %25 = tpu.matmul %22, %24, %cst_15 {dimension_numbers = #tpu.dot_dimension_numbers<[1], [0], [0], [1], [0, 0, 1, 1], [], []>} : vector<16x4xf32>, vector<4x8xf32>, vector<16x8xf32> -> vector<16x8xf32>
    %c0_16 = arith.constant 0 : index
    %c2_17 = arith.constant 2 : index
    %c0_18 = arith.constant 0 : index
    %26 = tpu.strided_load %arg1[%c0_16, %c2_17, %c0_18] {strides = array<i32: 1, 2, 1>} : memref<2x18x4xf32, #tpu.memory_space<vmem>>, vector<2x8x4xf32>
    %27 = vector.shape_cast %26 : vector<2x8x4xf32> to vector<16x4xf32>
    %28 = vector.extract_strided_slice %3 {offsets = [1, 0, 0], sizes = [1, 4, 8], strides = [1, 1, 1]} : vector<3x4x8xf32> to vector<1x4x8xf32>
    %29 = vector.shape_cast %28 : vector<1x4x8xf32> to vector<4x8xf32>
    %cst_19 = arith.constant dense<0.000000e+00> : vector<16x8xf32>
    %30 = tpu.matmul %27, %29, %cst_19 {dimension_numbers = #tpu.dot_dimension_numbers<[1], [0], [0], [1], [0, 0, 1, 1], [], []>} : vector<16x4xf32>, vector<4x8xf32>, vector<16x8xf32> -> vector<16x8xf32>
    %31 = arith.addf %25, %30 : vector<16x8xf32>
    %c0_20 = arith.constant 0 : index
    %c3 = arith.constant 3 : index
    %c0_21 = arith.constant 0 : index
    %32 = tpu.strided_load %arg1[%c0_20, %c3, %c0_21] {strides = array<i32: 1, 2, 1>} : memref<2x18x4xf32, #tpu.memory_space<vmem>>, vector<2x8x4xf32>
    %33 = vector.shape_cast %32 : vector<2x8x4xf32> to vector<16x4xf32>
    %34 = vector.extract_strided_slice %3 {offsets = [2, 0, 0], sizes = [1, 4, 8], strides = [1, 1, 1]} : vector<3x4x8xf32> to vector<1x4x8xf32>
    %35 = vector.shape_cast %34 : vector<1x4x8xf32> to vector<4x8xf32>
    %cst_22 = arith.constant dense<0.000000e+00> : vector<16x8xf32>
    %36 = tpu.matmul %33, %35, %cst_22 {dimension_numbers = #tpu.dot_dimension_numbers<[1], [0], [0], [1], [0, 0, 1, 1], [], []>} : vector<16x4xf32>, vector<4x8xf32>, vector<16x8xf32> -> vector<16x8xf32>
    %37 = arith.addf %31, %36 : vector<16x8xf32>
    %38 = arith.maximumf %20, %37 : vector<16x8xf32>
    %39 = vector.shape_cast %38 : vector<16x8xf32> to vector<2x8x8xf32>
    %c0_23 = arith.constant 0 : index
    %c0_24 = arith.constant 0 : index
    %c0_25 = arith.constant 0 : index
    %40 = vector.load %arg3[%c0_23, %c0_24, %c0_25] : memref<2x8x8xf32, #tpu.memory_space<vmem>>, vector<2x8x8xf32>
    tpu.vector_store %arg3[%c0_23, %c0_24, %c0_25], %39 {strides = array<i32>} : memref<2x8x8xf32, #tpu.memory_space<vmem>>, vector<2x8x8xf32>,
    %c0_26 = arith.constant 0 : index
    %c0_27 = arith.constant 0 : index
    %41 = vector.load %arg4[%c0_26, %c0_27] : memref<2x8xf32, #tpu.memory_space<vmem>>, vector<1x8xf32>
    %cst_28 = arith.constant dense<0.000000e+00> : vector<8xf32>
    %42 = vector.multi_reduction <add>, %38, %cst_28 [0] : vector<16x8xf32> to vector<8xf32>
    %43 = vector.shape_cast %42 : vector<8xf32> to vector<1x8xf32>
    %44 = arith.addf %41, %43 : vector<1x8xf32>
    %c0_29 = arith.constant 0 : index
    %c0_30 = arith.constant 0 : index
    %45 = vector.load %arg4[%c0_29, %c0_30] : memref<2x8xf32, #tpu.memory_space<vmem>>, vector<1x8xf32>
    tpu.vector_store %arg4[%c0_29, %c0_30], %44 {strides = array<i32>} : memref<2x8xf32, #tpu.memory_space<vmem>>, vector<1x8xf32>,
    %c1_31 = arith.constant 1 : index
    %c0_32 = arith.constant 0 : index
    %46 = vector.load %arg4[%c1_31, %c0_32] : memref<2x8xf32, #tpu.memory_space<vmem>>, vector<1x8xf32>
    %47 = arith.mulf %38, %38 : vector<16x8xf32>
    %cst_33 = arith.constant dense<0.000000e+00> : vector<8xf32>
    %48 = vector.multi_reduction <add>, %47, %cst_33 [0] : vector<16x8xf32> to vector<8xf32>
    %49 = vector.shape_cast %48 : vector<8xf32> to vector<1x8xf32>
    %50 = arith.addf %46, %49 : vector<1x8xf32>
    %c1_34 = arith.constant 1 : index
    %c0_35 = arith.constant 0 : index
    %51 = vector.load %arg4[%c1_34, %c0_35] : memref<2x8xf32, #tpu.memory_space<vmem>>, vector<1x8xf32>
    tpu.vector_store %arg4[%c1_34, %c0_35], %50 {strides = array<i32>} : memref<2x8xf32, #tpu.memory_space<vmem>>, vector<1x8xf32>,
    return
  }
  func.func @transform_0(%arg0: i32) -> (i32, i32, i32) {
    %c0_i32 = arith.constant 0 : i32
    %c0_i32_0 = arith.constant 0 : i32
    %c0_i32_1 = arith.constant 0 : i32
    return %arg0, %c0_i32, %c0_i32_0 : i32, i32, i32
  }
  func.func @transform_1(%arg0: i32) -> (i32, i32, i32) {
    %c0_i32 = arith.constant 0 : i32
    %c0_i32_0 = arith.constant 0 : i32
    %c0_i32_1 = arith.constant 0 : i32
    %c0_i32_2 = arith.constant 0 : i32
    return %c0_i32, %c0_i32_0, %c0_i32_1 : i32, i32, i32
  }
  func.func @transform_2(%arg0: i32) -> (i32, i32, i32) {
    %c0_i32 = arith.constant 0 : i32
    %c0_i32_0 = arith.constant 0 : i32
    %c0_i32_1 = arith.constant 0 : i32
    return %arg0, %c0_i32, %c0_i32_0 : i32, i32, i32
  }
  func.func @transform_3(%arg0: i32) -> (i32, i32) {
    %c0_i32 = arith.constant 0 : i32
    %c0_i32_0 = arith.constant 0 : i32
    %c0_i32_1 = arith.constant 0 : i32
    return %c0_i32, %c0_i32_0 : i32, i32
  }
}

</mosaic_0001>

<bundles_post_ra>
// kernel: tpu_custom_call.1
= control target key start
LH: loop header
LB: loop body
LE: loop exit
PB: predicated region body
PF: predicated region fallthrough
CT: control target
= control target key end

     0   :  { %9 = vsyncpa [#allocation3], 0  ;;  %vm38_vm0 = vcmask 1043456   ;;  %vm31_vm1 = vcmask 31744   ;;  %s806_s0 = inlined_call_operand.vmem [shape: f32[2,18,4], index: 0, kind: input, shape index: {}]   ;;  %s807_s1 = inlined_call_operand.vmem [shape: f32[3,4,8], index: 1, kind: input, shape index: {}]   ;;  %s808_s2 = inlined_call_operand.hbm [shape: f32[2,8,8], index: 2, kind: output, shape index: {0}]   ;;  %s809_s3 = inlined_call_operand.hbm [shape: f32[2,8], index: 3, kind: output, shape index: {1}]  }
   0x1   :  { %v22_v0 = vld [vmem:[%s807_s1 + $0x4] sm:$0xf]  ;;  %v21_v1 = vld [vmem:[%s807_s1] sm:$0xf]  ;;  %v23_v6 = vld [vmem:[%s807_s1 + $0x8] sm:$0xf] }
   0x2   :  { %633 = vmatprep.subr.msk.mxu0 %vm38_vm0, %v22_v0  ;;  %638 = vmatprep.subr.msk.mxu1 %vm38_vm0, %v21_v1  ;;  %v591_v2 = vld [vmem:[%s806_s0 + $0x1] ss:$2 sm:$0xff]  ;;  %v24_v3 = vld [vmem:[%s806_s0] ss:$2 sm:$0xff] }
   0x3   :  { %v592_v4 = vld [vmem:[%s806_s0 + $0x19] ss:$2 sm:$0xff]  ;;  %634 = vmatpush3.msk.msra.mxu0 %vm38_vm0, %v22_v0  ;;  %635 = vmatprep.mubr.msk.f32.mxu0 %vm31_vm1, %v591_v2  ;;  %v590_v5 = vld [vmem:[%s806_s0 + $0x18] ss:$2 sm:$0xff] }
   0x4   :  { %639 = vmatpush3.msk.msra.mxu1 %vm38_vm0, %v21_v1  ;;  %640 = vmatprep.mubr.msk.f32.mxu1 %vm31_vm1, %v24_v3  ;;  %v599_v7 = vld [vmem:[%s806_s0 + $0x2] ss:$2 sm:$0xff] }
   0x5   :  { %636 = vmatmul.mubr.msk.f32.vlgmr.msra.gmra.mxu0 %vm31_vm1, %v592_v4  ;;  %641 = vmatmul.mubr.msk.f32.vlgmr.msra.gmra.mxu1 %vm31_vm1, %v590_v5 }
   0x6   :  { %10 = vsyncpa [#allocation5], 0  ;;  %643 = vmatprep.subr.msk.mxu0 %vm38_vm0, %v23_v6  ;;  %648 = vmatprep.subr.msk.mxu1 %vm38_vm0, %v22_v0  ;;  %v600_v8 = vld [vmem:[%s806_s0 + $0x1a] ss:$2 sm:$0xff]  ;;  %v610_v9 = vld [vmem:[%s806_s0 + $0x3] ss:$2 sm:$0xff] }
   0x7   :  { %644 = vmatpush3.msk.msra.mxu0 %vm38_vm0, %v23_v6  ;;  %645 = vmatprep.mubr.msk.f32.mxu0 %vm31_vm1, %v599_v7  ;;  %v611_v10 = vld [vmem:[%s806_s0 + $0x1b] ss:$2 sm:$0xff]  ;;  %vm19_vm2 = vcmask 58368   ;;  %v712_v11 = vmov 0.0   ;;  %vm530_vm3 = vcmask 64512   ;;  %s713_s0 = smov [#allocation2]  }
   0x8   :  { %649 = vmatpush3.msk.msra.mxu1 %vm38_vm0, %v22_v0  ;;  %650 = vmatprep.mubr.msk.f32.mxu1 %vm31_vm1, %v599_v7  ;;  %20 = vst.msk [vmem:[#allocation4] sm:$0x3] %vm19_vm2, %v712_v11  ;;  %s565_s6 = sshll.u32 %s713_s0, 4  ;;  %s566_s6 = int_to_ptr.vmem [resolvable:$true] %s565_s6 }
   0x9   :  { %646 = vmatmul.mubr.msk.f32.vlgmr.msra.gmra.mxu0 %vm31_vm1, %v600_v8  ;;  %653 = vmatprep.subr.msk.mxu0 %vm38_vm0, %v21_v1  ;;  %s668_s7 = scalar_lea.vmem %s566_s6, 256  ;;  %p673_p1 = scmp.lt.s32.totalorder %s566_s6, %s566_s6 }
   0xa   :  { %651 = vmatmul.mubr.msk.f32.vlgmr.msra.gmra.mxu1 %vm31_vm1, %v600_v8  ;;  %654 = vmatpush3.msk.msra.mxu0 %vm38_vm0, %v21_v1  ;;  %p669_p0 = scmp.ne.s32.totalorder %s566_s6, %s668_s7  ;;  %p674_p2 = scmp.lt.s32.totalorder %s668_s7, %s668_s7 }
   0xb   :  { %658 = vmatprep.subr.msk.mxu1 %vm38_vm0, %v23_v6  ;;  %655 = vmatprep.mubr.msk.f32.mxu0 %vm31_vm1, %v591_v2 }
   0xc   :  { %659 = vmatpush3.msk.msra.mxu1 %vm38_vm0, %v23_v6  ;;  %660 = vmatprep.mubr.msk.f32.mxu1 %vm31_vm1, %v610_v9  ;;  %p675_p3 = por %p674_p2, %p673_p1 }
   0xd   :  { %656 = vmatmul.mubr.msk.f32.vlgmr.msra.gmra.mxu0 %vm31_vm1, %v592_v4 }
   0xe   :  { %661 = vmatmul.mubr.msk.f32.vlgmr.msra.gmra.mxu1 %vm31_vm1, %v611_v10  ;;  %p676_p4 = pnand %p675_p3, %p669_p0 }
  0xc5   :  { %v637_v12 = vpop.f32.mrf.mxu0  ;;  %v642_v13 = vpop.f32.mrf.mxu1 }
  0xc6   :  { %v198_v21 = vadd.f32 %v642_v13, %v637_v12 }
  0xc7   :  { %v108_v14 = vpop.f32.mrf.mxu0  ;;  %v192_v15 = vpop.f32.mrf.mxu1 }
  0xc8   :  { %v193_v25 = vadd.f32 %v192_v15, %v108_v14 }
  0xc9   :  { %v647_v16 = vpop.f32.mrf.mxu0 }
  0xca   :  { %v652_v17 = vpop.f32.mrf.mxu1  ;;  %v290_v26 = vadd.f32 %v647_v16, %v198_v21 }
  0xcb   :  { %v280_v18 = vpop.f32.mrf.mxu0 }
  0xcc   :  { %v357_v19 = vpop.f32.mrf.mxu1  ;;  %v289_v30 = vadd.f32 %v280_v18, %v193_v25 }
  0xcd   :  { %v657_v20 = vpop.f32.mrf.mxu0 }
  0xce   :  { %v438_v22 = vadd.f32 %v657_v20, %v652_v17  ;;  %v662_v23 = vpop.f32.mrf.mxu1 }
  0xcf   :  { %v432_v24 = vpop.f32.mrf.mxu0 }
  0xd0   :  { %v527_v27 = vadd.f32 %v662_v23, %v438_v22  ;;  %v433_v28 = vadd.f32 %v432_v24, %v357_v19  ;;  %v517_v29 = vpop.f32.mrf.mxu1 }
  0xd2   :  { %v529_v31 = vmax.f32 %v290_v26, %v527_v27  ;;  %v526_v32 = vadd.f32 %v517_v29, %v433_v28 }
  0xd4   :  { %v548_v33 = vmul.f32 %v529_v31, %v529_v31  ;;  %532 = vst.msk [vmem:[#allocation2 + $0x8] sm:$0xff] %vm530_vm3, %v529_v31  ;;  %v528_v34 = vmax.f32 %v289_v30, %v526_v32  ;;  %v535_v35 = vsel %vm530_vm3, %v529_v31, 0.0 }
  0xd6   :  { %v534_v36 = vsel %vm530_vm3, %v528_v34, 0.0  ;;  %v547_v37 = vmul.f32 %v528_v34, %v528_v34  ;;  %531 = vst.msk [vmem:[#allocation2] sm:$0xff] %vm530_vm3, %v528_v34 }
  0xd7   :  { %v536_v38 = vadd.f32 %v535_v35, %v534_v36 }
  0xd8   :  { %679 = shalt.err (!%p676_p4)
}
  0xd9   :  { %s714_s8 = smov 128   ;;  %s715_s9 = smov 8   ;;  %v550_v39 = vsel %vm530_vm3, %v548_v33, 0.0  ;;  %v549_v40 = vsel %vm530_vm3, %v547_v37, 0.0  ;;  %v537_v41 = vrot.slane %v536_v38, 4  ;;  %vm544_vm4 = vcmask 57344  }
  0xda   :  { %571 = dma.vmem_to_hbm [thread:$0]  %s566_s6, 256, %s808_s2, [#allocation3], %s714_s8, %s714_s8, %s715_s9   ;;  %v551_v42 = vadd.f32 %v550_v39, %v549_v40  ;;  %v533_v51 = vld [vmem:[#allocation4] sm:$0x1]  ;;  %v546_v54 = vld [vmem:[#allocation4 + $0x1] sm:$0x1] }
  0xdb   :  { %v538_v43 = vadd.f32 %v537_v41, %v536_v38  ;;  %s716_s2 = smov [#allocation4]  }
  0xdc   :  { %v552_v44 = vrot.slane %v551_v42, 4  ;;  %s578_s12 = sshll.u32 %s716_s2, 4  ;;  %s579_s12 = int_to_ptr.vmem [resolvable:$true] %s578_s12 }
  0xdd   :  { %v539_v45 = vrot.slane %v538_v43, 2  ;;  %s688_s13 = scalar_lea.vmem %s579_s12, 32  ;;  %p693_p6 = scmp.lt.s32.totalorder %s579_s12, %s579_s12 }
  0xde   :  { %v553_v46 = vadd.f32 %v552_v44, %v551_v42  ;;  %p689_p5 = scmp.ne.s32.totalorder %s579_s12, %s688_s13  ;;  %p694_p7 = scmp.lt.s32.totalorder %s688_s13, %s688_s13 }
  0xdf   :  { %v540_v47 = vadd.f32 %v539_v45, %v538_v43 }
  0xe0   :  { %v554_v48 = vrot.slane %v553_v46, 2  ;;  %p695_p8 = por %p694_p7, %p693_p6 }
  0xe1   :  { %v541_v49 = vrot.slane %v540_v47, 1 }
  0xe2   :  { %v555_v50 = vadd.f32 %v554_v48, %v553_v46  ;;  %p696_p9 = pnand %p695_p8, %p689_p5 }
  0xe3   :  { %v542_v52 = vadd.f32 %v541_v49, %v540_v47 }
  0xe4   :  { %v556_v53 = vrot.slane %v555_v50, 1 }
  0xe5   :  { %v543_v55 = vadd.f32 %v542_v52, %v533_v51 }
  0xe6   :  { %v557_v56 = vadd.f32 %v556_v53, %v555_v50 }
  0xe7   :  { %545 = vst.msk [vmem:[#allocation4] sm:$0x1] %vm544_vm4, %v543_v55 }
  0xe8   :  { %v558_v57 = vadd.f32 %v557_v56, %v546_v54 }
  0xea   :  { %559 = vst.msk [vmem:[#allocation4 + $0x1] sm:$0x1] %vm544_vm4, %v558_v57 }
  0xeb   :  { %699 = shalt.err (!%p696_p9)
}
  0xec   :  { %581 = dma.vmem_to_hbm [thread:$0]  %s579_s12, 32, %s809_s3, [#allocation5]  }
  0xed   :  { %708 = dma.done.wait [#allocation3], 256  }
  0xee   :  { %709 = vsyncadd [#allocation3], 4294967040 }
  0xef   :  { %710 = dma.done.wait [#allocation5], 32  }
  0xf0   :  { %711 = vsyncadd [#allocation5], 4294967264 }
  0xf1   :  { %588 = vsyncpa [#allocation3], 1 }
  0xf2   :  { %589 = vsyncpa [#allocation5], 1 }

</bundles_post_ra>
